<compile_context>
chip_gen: v7x
topology: tpu7x:2x2x1
jax: 0.10.0
libtpu: 0.0.40
codegen_flags: <defaults>
</compile_context>

<pallas_src>
import functools

import jax
import jax.numpy as jnp
from jax.experimental import pallas as pl
from jax.experimental.pallas import tpu as pltpu

_LANE = 128


def _hinge_kernel(x_ref, o_ref, *, margin):
    # relu(margin - x), computed natively in the element dtype.
    x = x_ref[...]
    m = jnp.asarray(margin, dtype=x.dtype)
    zero = jnp.asarray(0, dtype=x.dtype)
    o_ref[...] = jnp.maximum(m - x, zero)


def _block_bytes_for_device():
    """Per-buffer block size in bytes, tuned per TPU generation."""
    try:
        kind = jax.devices()[0].device_kind.lower()
    except Exception:
        kind = ""
    if "v5 lite" in kind or "v5e" in kind or "v5lite" in kind:
        return 2 << 20   # v5e: stay modest (small default scoped VMEM, slow HBM)
    return 4 << 20       # v6e / v7x: amortize the ~0.35us per-step overhead


def _hinge_2d(x2d, margin):
    """relu(margin - x) on a lane-dense 2D slab via pallas_call."""
    rows, W = x2d.shape
    itemsize = jnp.dtype(x2d.dtype).itemsize
    sub = max(8, 32 // itemsize)          # sublane multiple for this dtype

    block_bytes = _block_bytes_for_device()
    target_rows = max(sub, (block_bytes // (W * itemsize) // sub) * sub)
    tile_r = min(rows, target_rows)

    # Prefer >= 2 grid steps (megacore sharding on v7x) while keeping each
    # block >= ~1 MiB.
    if tile_r >= rows:
        half_rows = -(-rows // 2)                  # cdiv(rows, 2)
        half_rows = -(-half_rows // sub) * sub     # round up to sublane mult
        if half_rows < rows and half_rows * W * itemsize >= (1 << 20):
            tile_r = half_rows

    if tile_r < rows:
        tile_r = max(sub, (tile_r // sub) * sub)   # sublane-aligned tile
    else:
        tile_r = rows                              # full-extent block: legal

    grid = (pl.cdiv(rows, tile_r),)

    return pl.pallas_call(
        functools.partial(_hinge_kernel, margin=float(margin)),
        out_shape=jax.ShapeDtypeStruct((rows, W), x2d.dtype),
        grid_spec=pltpu.PrefetchScalarGridSpec(
            num_scalar_prefetch=0,
            grid=grid,
            in_specs=[pl.BlockSpec((tile_r, W), lambda i: (i, 0))],
            out_specs=pl.BlockSpec((tile_r, W), lambda i: (i, 0)),
        ),
        compiler_params=pltpu.CompilerParams(
            dimension_semantics=("parallel",),
            vmem_limit_bytes=40 << 20,
        ),
    )(x2d)


def hinge_loss(output: jax.Array, margin: float = 1.0) -> jax.Array:
    """Elementwise relu(margin - output); same semantics as the nn.Module."""
    orig_shape = output.shape

    # Match torch type promotion: python-float margin with an integer tensor
    # promotes to float32; with a floating tensor it stays in that dtype.
    if not jnp.issubdtype(output.dtype, jnp.floating):
        output = output.astype(jnp.float32)
    dtype = output.dtype

    x = output.reshape(-1)
    n = x.shape[0]
    aligned = (n // _LANE) * _LANE

    if aligned == 0:
        # Tiny (<128 element) input: pure jnp, not worth a kernel launch.
        m = jnp.asarray(margin, dtype=dtype)
        return jnp.maximum(m - x, jnp.asarray(0, dtype=dtype)).reshape(orig_shape)

    # Lane-dense width: largest multiple of 128 (<= 2048) dividing the slab.
    W = _LANE
    for cand in (2048, 1024, 512, 256):
        if aligned % cand == 0:
            W = cand
            break
    rows = aligned // W

    prefix = x if aligned == n else x[:aligned]
    main_out = _hinge_2d(prefix.reshape(rows, W), margin).reshape(-1)

    if aligned == n:
        return main_out.reshape(orig_shape)

    # <128-element ragged tail: plain jnp, no full-array pad/slice round-trips.
    m = jnp.asarray(margin, dtype=dtype)
    tail_out = jnp.maximum(m - x[aligned:], jnp.asarray(0, dtype=dtype))
    return jnp.concatenate([main_out, tail_out]).reshape(orig_shape)


def _reference(output, margin=1.0):
    # pure-JAX reference: F.relu(margin - output)
    if not jnp.issubdtype(output.dtype, jnp.floating):
        output = output.astype(jnp.float32)
    m = jnp.asarray(margin, dtype=output.dtype)
    return jnp.maximum(m - output, jnp.asarray(0, dtype=output.dtype))


if __name__ == "__main__":
    key = jax.random.PRNGKey(0)
    # small NCHW-like input consistent with a per-element hinge loss
    x = jax.random.normal(key, (2, 4, 16, 16), dtype=jnp.float32)

    y = jax.block_until_ready(hinge_loss(x))
    y_ref = _reference(x)
    assert y.shape == x.shape and y.dtype == x.dtype
    assert jnp.allclose(y, y_ref, atol=1e-6, rtol=1e-6)

    # bf16 path (native-dtype compute, dtype-aware sublane rounding)
    xb = x.astype(jnp.bfloat16)
    yb = jax.block_until_ready(hinge_loss(xb))
    assert yb.shape == xb.shape and yb.dtype == jnp.bfloat16
    assert jnp.allclose(yb.astype(jnp.float32),
                        _reference(xb).astype(jnp.float32),
                        atol=1e-2, rtol=1e-2)

    # non-lane-aligned length: kernel on the aligned prefix + jnp tail
    x3 = jax.random.normal(jax.random.PRNGKey(1), (3, 7, 13), dtype=jnp.float32)
    y3 = jax.block_until_ready(hinge_loss(x3))
    assert y3.shape == x3.shape
    assert jnp.allclose(y3, _reference(x3), atol=1e-6, rtol=1e-6)

    print("KERNEL_OK")
</pallas_src>

<mosaic_0001>
module attributes {stable_mosaic.version = 11 : i64} {
  func.func @_hinge_kernel(%arg0: i32, %arg1: memref<1x2048xf32, #tpu.memory_space<vmem>>, %arg2: memref<1x2048xf32, #tpu.memory_space<vmem>>) attributes {dimension_semantics = [#tpu.dimension_semantics<parallel>], iteration_bounds = array<i64: 1>, scalar_prefetch = 0 : i64, scratch_operands = 0 : i64, tpu.core_type = #tpu.core_type<tc>, window_params = [{transform_indices = @transform_0, window_bounds = array<i64: 1, 2048>}, {transform_indices = @transform_1, window_bounds = array<i64: 1, 2048>}]} {
    %c0 = arith.constant 0 : index
    %c0_0 = arith.constant 0 : index
    %0 = vector.load %arg1[%c0, %c0_0] : memref<1x2048xf32, #tpu.memory_space<vmem>>, vector<1x2048xf32>
    %cst = arith.constant 1.000000e+00 : f32
    %1 = vector.broadcast %cst : f32 to vector<1x2048xf32>
    %2 = arith.subf %1, %0 : vector<1x2048xf32>
    %cst_1 = arith.constant 0.000000e+00 : f32
    %3 = vector.broadcast %cst_1 : f32 to vector<1x2048xf32>
    %4 = arith.maximumf %2, %3 : vector<1x2048xf32>
    %c0_2 = arith.constant 0 : index
    %c0_3 = arith.constant 0 : index
    %5 = vector.load %arg2[%c0_2, %c0_3] : memref<1x2048xf32, #tpu.memory_space<vmem>>, vector<1x2048xf32>
    tpu.vector_store %arg2[%c0_2, %c0_3], %4 {strides = array<i32>} : memref<1x2048xf32, #tpu.memory_space<vmem>>, vector<1x2048xf32>,
    return
  }
  func.func @transform_0(%arg0: i32) -> (i32, i32) {
    %c0_i32 = arith.constant 0 : i32
    %c0_i32_0 = arith.constant 0 : i32
    return %arg0, %c0_i32 : i32, i32
  }
  func.func @transform_1(%arg0: i32) -> (i32, i32) {
    %c0_i32 = arith.constant 0 : i32
    %c0_i32_0 = arith.constant 0 : i32
    return %arg0, %c0_i32 : i32, i32
  }
}

</mosaic_0001>

<bundles_post_ra>
// kernel: tpu_custom_call.1
= control target key start
LH: loop header
LB: loop body
LE: loop exit
PB: predicated region body
PF: predicated region fallthrough
CT: control target
= control target key end

     0   :  { %6 = vsyncpa [#allocation3], 0  ;;  %s130_s0 = inlined_call_operand.hbm [shape: f32[1,2048], index: 0, kind: input, shape index: {}]   ;;  %s131_s1 = inlined_call_operand.hbm [shape: f32[1,2048], index: 1, kind: output, shape index: {}]  }
   0x1   :  { %7 = vsyncpa [#allocation4], 0  ;;  %s94_s6 = smov [#allocation2]   ;;  %s46_s10 = scalar_lea.hbm %s130_s0, 256 }
   0x2   :  { %s14_s7 = sshll.u32 %s94_s6, 4  ;;  %p47_p0 = scmp.ne.s32.totalorder %s130_s0, %s46_s10  ;;  %s15_s7 = int_to_ptr.vmem [resolvable:$true] %s14_s7 }
   0x3   :  { %p50_p1 = scmp.lt.u32.totalorder %s46_s10, %s130_s0 }
   0x5   :  { %p52_p2 = pnand %p50_p1, %p47_p0 }
   0x7   :  { %55 = shalt.err (!%p52_p2)
}
   0x8   :  { %s56_s15 = scalar_lea.vmem %s15_s7, 256  ;;  %p61_p4 = scmp.lt.s32.totalorder %s15_s7, %s15_s7 }
   0x9   :  { %p57_p3 = scmp.ne.s32.totalorder %s15_s7, %s56_s15  ;;  %p62_p5 = scmp.lt.s32.totalorder %s56_s15, %s56_s15 }
   0xb   :  { %p63_p6 = por %p62_p5, %p61_p4 }
   0xd   :  { %p64_p7 = pnand %p63_p6, %p57_p3 }
   0xf   :  { %67 = shalt.err (!%p64_p7)
}
  0x10   :  { %17 = dma.hbm_to_vmem [thread:$0]  %s130_s0, 256, %s15_s7, [#allocation3]  }
  0x11   :  { %90 = dma.done.wait [#allocation3], 256  }
  0x12   :  { %91 = vsyncadd [#allocation3], 4294967040  ;;  %v21_v0 = vld [vmem:[#allocation2] sm:$0xff]  ;;  %v22_v1 = vld [vmem:[#allocation2 + $0x8] sm:$0xff]  ;;  %s95_s18 = smov [#allocation5]  }
  0x13   :  { %s35_s19 = sshll.u32 %s95_s18, 4  ;;  %v23_v2 = vsub.f32 1.0, %v21_v0  ;;  %v24_v3 = vsub.f32 1.0, %v22_v1  ;;  %s36_s19 = int_to_ptr.vmem [resolvable:$true] %s35_s19 }
  0x14   :  { %s68_s20 = scalar_lea.vmem %s36_s19, 256  ;;  %p73_p9 = scmp.lt.s32.totalorder %s36_s19, %s36_s19 }
  0x15   :  { %v25_v4 = vmax.f32 %v23_v2, 0.0  ;;  %v26_v5 = vmax.f32 %v24_v3, 0.0  ;;  %p69_p8 = scmp.ne.s32.totalorder %s36_s19, %s68_s20  ;;  %p74_p10 = scmp.lt.s32.totalorder %s68_s20, %s68_s20 }
  0x17   :  { %27 = vst [vmem:[#allocation5] sm:$0xff] %v25_v4  ;;  %28 = vst [vmem:[#allocation5 + $0x8] sm:$0xff] %v26_v5  ;;  %p75_p11 = por %p74_p10, %p73_p9 }
  0x19   :  { %p76_p12 = pnand %p75_p11, %p69_p8 }
  0x1b   :  { %79 = shalt.err (!%p76_p12)
}
  0x1c   :  { %s80_s22 = scalar_lea.hbm %s131_s1, 256 }
  0x1d   :  { %p81_p13 = scmp.ne.s32.totalorder %s131_s1, %s80_s22  ;;  %p84_p0 = scmp.lt.u32.totalorder %s80_s22, %s131_s1 }
  0x1f   :  { %p86_p1 = pnand %p84_p0, %p81_p13 }
  0x21   :  { %89 = shalt.err (!%p86_p1)
}
  0x22   :  { %38 = dma.vmem_to_hbm [thread:$0]  %s36_s19, 256, %s131_s1, [#allocation4]  }
  0x23   :  { %92 = dma.done.wait [#allocation4], 256  }
  0x24   :  { %93 = vsyncadd [#allocation4], 4294967040 }
  0x25   :  { %42 = vsyncpa [#allocation3], 1 }
  0x26   :  { %43 = vsyncpa [#allocation4], 1 }

</bundles_post_ra>
